<compile_context>
chip_gen: v5e
topology: v5e:2x2
jax: 0.10.0
libtpu: 0.0.40
codegen_flags: <defaults>
</compile_context>

<pallas_src>
import functools

import jax
import jax.numpy as jnp
from jax.experimental import pallas as pl
from jax.experimental.pallas import tpu as pltpu

EPS = 1e-5
MXU_DTYPE = jnp.bfloat16       # MXU operands only; BN math stays f32


# ----------------------------- weight folding -------------------------------
def _conv3x3_to_banded(w_hwio, W):
    """(3,3,Cin,Cout) HWIO -> (3, W*Cin, W*Cout), one block-banded matrix per dy.

    In the lane-flattened (rows=N*H, lanes=W*C) layout, the dx (width) shift and
    its zero padding become a shifted-identity left factor folded into the
    weights, so each dy tap of the 3x3 conv is a single matmul against a
    row-shifted copy of the input (dy handled in-kernel via pltpu.roll + masks).
    """
    kH, kW, Cin, Cout = w_hwio.shape
    blocks = []
    for dy in range(kH):
        w_dy = jnp.zeros((W * Cin, W * Cout), w_hwio.dtype)
        for dx in range(kW):
            # S[w_src, w_dst] = 1 iff w_src == w_dst + dx - 1 (edges -> zero pad)
            shift = jnp.eye(W, k=1 - dx, dtype=w_hwio.dtype)
            w_dy = w_dy + jnp.kron(shift, w_hwio[dy, dx])
        blocks.append(w_dy)
    return jnp.stack(blocks, axis=0)


# --------------------------------- kernel -----------------------------------
def _resblock_kernel(x_ref, w1_ref, g1_ref, b1_ref, w2_ref, g2_ref, b2_ref,
                     f_ref, ft_ref, o_ref, *, H):
    NH, WC = x_ref.shape
    C = f_ref.shape[1]
    W = WC // C
    M = NH * W                                   # samples per channel for BN

    rid = jax.lax.broadcasted_iota(jnp.int32, (NH, 1), 0)
    top = (rid % H) == 0                         # first row of each image
    bot = (rid % H) == (H - 1)                   # last row of each image

    x = x_ref[...]                               # (NH, WC) f32, loaded once

    def conv_bn(v, w_ref, g_ref, b_ref):
        # dy = -1 / 0 / +1 row taps via XLU sublane rolls; cross-image rows
        # (and the circular wraparound) masked to zero == the H zero padding.
        up = jnp.where(top, 0.0, pltpu.roll(v, shift=1, axis=0))
        dn = jnp.where(bot, 0.0, pltpu.roll(v, shift=NH - 1, axis=0))

        # three per-dy MXU matmuls (bf16 operands), accumulated in f32.
        acc = jnp.dot(up.astype(MXU_DTYPE), w_ref[0],
                      preferred_element_type=jnp.float32)
        acc += jnp.dot(v.astype(MXU_DTYPE), w_ref[1],
                       preferred_element_type=jnp.float32)
        acc += jnp.dot(dn.astype(MXU_DTYPE), w_ref[2],
                       preferred_element_type=jnp.float32)
        # conv bias intentionally omitted: cancelled exactly by BN's mean sub
        # (valid only for training-mode BatchNorm, i.e. batch statistics).

        # one-pass per-channel BN stats: reduce rows first (XLU), then fold
        # W -> channel with a tiny (1, WC) x (WC, C) matmul.  All f32.
        s_row = jnp.sum(acc, axis=0, keepdims=True)                  # (1, WC)
        ss_row = jnp.sum(acc * acc, axis=0, keepdims=True)           # (1, WC)
        s_c = jnp.dot(s_row, f_ref[...], preferred_element_type=jnp.float32)
        ss_c = jnp.dot(ss_row, f_ref[...], preferred_element_type=jnp.float32)
        mean = s_c / M
        var = ss_c / M - mean * mean
        scale_c = g_ref[...] * jax.lax.rsqrt(var + EPS)              # (1, C)
        shift_c = b_ref[...] - mean * scale_c                        # (1, C)
        scale = jnp.dot(scale_c, ft_ref[...],
                        preferred_element_type=jnp.float32)          # (1, WC)
        shift = jnp.dot(shift_c, ft_ref[...],
                        preferred_element_type=jnp.float32)          # (1, WC)
        return acc * scale + shift                                   # (NH, WC)

    h1 = jnp.maximum(conv_bn(x, w1_ref, g1_ref, b1_ref), 0.0)  # conv1+BN1+ReLU
    y = conv_bn(h1, w2_ref, g2_ref, b2_ref) + x                 # conv2+BN2+skip
    o_ref[...] = y.astype(o_ref.dtype)                          # lane-dense store


# -------------------------------- wrapper ------------------------------------
def res_block(x, params):
    """Identity-shortcut ResBlock forward.  x: (N, H, W, C) float32 (NHWC)."""
    N, H, W, C = x.shape
    NH, WC = N * H, W * C
    # lane-flattened single-slab design; real shapes need the tiled/grid version
    assert WC <= 1024, "W*C too large for the un-tiled lane-flattened kernel"

    # Layout plumbing only (free contiguous reshapes): NHWC -> (N*H, W*C).
    x_flat = x.reshape(NH, WC)
    w1 = _conv3x3_to_banded(params["w1"], W).astype(MXU_DTYPE)   # (3, WC, WC)
    w2 = _conv3x3_to_banded(params["w2"], W).astype(MXU_DTYPE)
    fold = jnp.tile(jnp.eye(C, dtype=jnp.float32), (W, 1))       # (WC, C)
    unfold = fold.T                                              # (C, WC)

    # Explicit VMEM budget (keeps the kernel honest on v7x's 64 MiB VMEM).
    w_item = jnp.dtype(MXU_DTYPE).itemsize
    vmem_bytes = (
        4 * NH * WC                 # input slab
        + 4 * NH * WC               # output slab
        + 2 * 3 * WC * WC * w_item  # two block-banded weights
        + 2 * 4 * WC * C            # fold / unfold
        + 4 * 4 * C                 # gammas / betas (tiny)
    )
    vmem_limit = int(min(64 << 20, 2 * vmem_bytes + (4 << 20)))

    vmem = lambda: pl.BlockSpec(memory_space=pltpu.MemorySpace.VMEM)
    out_flat = pl.pallas_call(
        functools.partial(_resblock_kernel, H=H),
        out_shape=jax.ShapeDtypeStruct((NH, WC), jnp.float32),
        in_specs=[vmem() for _ in range(9)],
        out_specs=vmem(),
        compiler_params=pltpu.CompilerParams(vmem_limit_bytes=vmem_limit),
    )(x_flat, w1, params["g1"], params["beta1"],
      w2, params["g2"], params["beta2"], fold, unfold)
    return out_flat.reshape(N, H, W, C)


# ----------------------------- pure-JAX reference ----------------------------
def _ref_conv_bn(x, w, b, gamma, beta):
    y = jax.lax.conv_general_dilated(
        x, w, window_strides=(1, 1), padding=((1, 1), (1, 1)),
        dimension_numbers=("NHWC", "HWIO", "NHWC"))
    y = y + b.reshape(1, 1, 1, -1)                 # conv bias (kernel drops it)
    mean = jnp.mean(y, axis=(0, 1, 2), keepdims=True)
    var = jnp.mean((y - mean) ** 2, axis=(0, 1, 2), keepdims=True)
    y = (y - mean) * jax.lax.rsqrt(var + EPS)
    return y * gamma.reshape(1, 1, 1, -1) + beta.reshape(1, 1, 1, -1)


def res_block_ref(x, params):
    h = jax.nn.relu(_ref_conv_bn(x, params["w1"], params["b1"],
                                 params["g1"], params["beta1"]))
    h = _ref_conv_bn(h, params["w2"], params["b2"],
                     params["g2"], params["beta2"])
    return h + x


# ----------------------------------- main ------------------------------------
if __name__ == "__main__":
    N, H, W, C = 2, 16, 16, 8   # in_channels == out_channels, stride == 1

    key = jax.random.PRNGKey(0)
    ks = jax.random.split(key, 9)
    scale = 1.0 / (3 * 3 * C) ** 0.5  # ~PyTorch Conv2d default init scale
    params = {
        "w1":    jax.random.uniform(ks[0], (3, 3, C, C), jnp.float32, -scale, scale),
        "b1":    jax.random.uniform(ks[1], (1, C), jnp.float32, -scale, scale),
        "g1":    jax.random.uniform(ks[2], (1, C), jnp.float32, 0.5, 1.5),
        "beta1": jax.random.uniform(ks[3], (1, C), jnp.float32, -0.5, 0.5),
        "w2":    jax.random.uniform(ks[4], (3, 3, C, C), jnp.float32, -scale, scale),
        "b2":    jax.random.uniform(ks[5], (1, C), jnp.float32, -scale, scale),
        "g2":    jax.random.uniform(ks[6], (1, C), jnp.float32, 0.5, 1.5),
        "beta2": jax.random.uniform(ks[7], (1, C), jnp.float32, -0.5, 0.5),
    }
    x = jax.random.normal(ks[8], (N, H, W, C), jnp.float32)

    out = jax.block_until_ready(jax.jit(res_block)(x, params))
    ref = jax.block_until_ready(res_block_ref(x, params))

    assert out.shape == (N, H, W, C)
    # bf16 MXU operands (f32 accumulation / BN math) -> looser tolerance.
    assert jnp.max(jnp.abs(out - ref)) < 7e-2, "mismatch vs JAX reference"
    print("KERNEL_OK")
</pallas_src>

<mosaic_0001>
module attributes {stable_mosaic.version = 11 : i64} {
  func.func @_resblock_kernel(%arg0: memref<32x128xf32, #tpu.memory_space<vmem>>, %arg1: memref<3x128x128xbf16, #tpu.memory_space<vmem>>, %arg2: memref<1x8xf32, #tpu.memory_space<vmem>>, %arg3: memref<1x8xf32, #tpu.memory_space<vmem>>, %arg4: memref<3x128x128xbf16, #tpu.memory_space<vmem>>, %arg5: memref<1x8xf32, #tpu.memory_space<vmem>>, %arg6: memref<1x8xf32, #tpu.memory_space<vmem>>, %arg7: memref<128x8xf32, #tpu.memory_space<vmem>>, %arg8: memref<8x128xf32, #tpu.memory_space<vmem>>, %arg9: memref<32x128xf32, #tpu.memory_space<vmem>>) attributes {dimension_semantics = [], scalar_prefetch = 0 : i64, scratch_operands = 0 : i64, tpu.core_type = #tpu.core_type<tc>} {
    %0 = tpu.iota {dimensions = array<i32: 0>} : vector<32x1xi32>
    %c16_i32 = arith.constant 16 : i32
    %c0_i32 = arith.constant 0 : i32
    %1 = arith.cmpi eq, %c16_i32, %c0_i32 : i32
    %c1_i32 = arith.constant 1 : i32
    %2 = arith.select %1, %c1_i32, %c16_i32 : i32
    %3 = vector.broadcast %2 : i32 to vector<32x1xi32>
    %4 = arith.remsi %0, %3 : vector<32x1xi32>
    %c0_i32_0 = arith.constant 0 : i32
    %5 = vector.broadcast %c0_i32_0 : i32 to vector<32x1xi32>
    %6 = arith.cmpi ne, %4, %5 : vector<32x1xi32>
    %c0_i32_1 = arith.constant 0 : i32
    %7 = vector.broadcast %c0_i32_1 : i32 to vector<32x1xi32>
    %8 = arith.cmpi slt, %4, %7 : vector<32x1xi32>
    %c0_i32_2 = arith.constant 0 : i32
    %9 = arith.cmpi slt, %2, %c0_i32_2 : i32
    %10 = vector.broadcast %9 : i1 to vector<32x1xi1>
    %11 = vector.broadcast %10 : vector<32x1xi1> to vector<32x1xi1>
    %12 = arith.xori %8, %11 : vector<32x1xi1>
    %13 = arith.andi %12, %6 : vector<32x1xi1>
    %14 = vector.broadcast %2 : i32 to vector<32x1xi32>
    %15 = arith.addi %4, %14 : vector<32x1xi32>
    %16 = arith.select %13, %15, %4 : vector<32x1xi1>, vector<32x1xi32>
    %c0_i32_3 = arith.constant 0 : i32
    %17 = vector.broadcast %c0_i32_3 : i32 to vector<32x1xi32>
    %18 = arith.cmpi eq, %16, %17 : vector<32x1xi32>
    %c16_i32_4 = arith.constant 16 : i32
    %c0_i32_5 = arith.constant 0 : i32
    %19 = arith.cmpi eq, %c16_i32_4, %c0_i32_5 : i32
    %c1_i32_6 = arith.constant 1 : i32
    %20 = arith.select %19, %c1_i32_6, %c16_i32_4 : i32
    %21 = vector.broadcast %20 : i32 to vector<32x1xi32>
    %22 = arith.remsi %0, %21 : vector<32x1xi32>
    %c0_i32_7 = arith.constant 0 : i32
    %23 = vector.broadcast %c0_i32_7 : i32 to vector<32x1xi32>
    %24 = arith.cmpi ne, %22, %23 : vector<32x1xi32>
    %c0_i32_8 = arith.constant 0 : i32
    %25 = vector.broadcast %c0_i32_8 : i32 to vector<32x1xi32>
    %26 = arith.cmpi slt, %22, %25 : vector<32x1xi32>
    %c0_i32_9 = arith.constant 0 : i32
    %27 = arith.cmpi slt, %20, %c0_i32_9 : i32
    %28 = vector.broadcast %27 : i1 to vector<32x1xi1>
    %29 = vector.broadcast %28 : vector<32x1xi1> to vector<32x1xi1>
    %30 = arith.xori %26, %29 : vector<32x1xi1>
    %31 = arith.andi %30, %24 : vector<32x1xi1>
    %32 = vector.broadcast %20 : i32 to vector<32x1xi32>
    %33 = arith.addi %22, %32 : vector<32x1xi32>
    %34 = arith.select %31, %33, %22 : vector<32x1xi1>, vector<32x1xi32>
    %c15_i32 = arith.constant 15 : i32
    %35 = vector.broadcast %c15_i32 : i32 to vector<32x1xi32>
    %36 = arith.cmpi eq, %34, %35 : vector<32x1xi32>
    %c0 = arith.constant 0 : index
    %c0_10 = arith.constant 0 : index
    %37 = vector.load %arg0[%c0, %c0_10] : memref<32x128xf32, #tpu.memory_space<vmem>>, vector<32x128xf32>
    %c1_i32_11 = arith.constant 1 : i32
    %38 = tpu.dynamic_rotate %37 by %c1_i32_11 dim 0 : vector<32x128xf32>, i32 -> vector<32x128xf32>
    %cst = arith.constant 0.000000e+00 : f32
    %39 = vector.shape_cast %18 : vector<32x1xi1> to vector<32x1xi1>
    %40 = vector.broadcast %39 : vector<32x1xi1> to vector<32x128xi1>
    %41 = vector.broadcast %cst : f32 to vector<32x128xf32>
    %42 = arith.select %40, %41, %38 : vector<32x128xi1>, vector<32x128xf32>
    %c31_i32 = arith.constant 31 : i32
    %43 = tpu.dynamic_rotate %37 by %c31_i32 dim 0 : vector<32x128xf32>, i32 -> vector<32x128xf32>
    %cst_12 = arith.constant 0.000000e+00 : f32
    %44 = vector.shape_cast %36 : vector<32x1xi1> to vector<32x1xi1>
    %45 = vector.broadcast %44 : vector<32x1xi1> to vector<32x128xi1>
    %46 = vector.broadcast %cst_12 : f32 to vector<32x128xf32>
    %47 = arith.select %45, %46, %43 : vector<32x128xi1>, vector<32x128xf32>
    %48 = arith.truncf %42 : vector<32x128xf32> to vector<32x128xbf16>
    %c0_13 = arith.constant 0 : index
    %c0_14 = arith.constant 0 : index
    %c0_15 = arith.constant 0 : index
    %49 = vector.load %arg1[%c0_13, %c0_14, %c0_15] : memref<3x128x128xbf16, #tpu.memory_space<vmem>>, vector<1x128x128xbf16>
    %50 = vector.shape_cast %49 : vector<1x128x128xbf16> to vector<128x128xbf16>
    %cst_16 = arith.constant dense<0.000000e+00> : vector<32x128xf32>
    %51 = tpu.matmul %48, %50, %cst_16 {dimension_numbers = #tpu.dot_dimension_numbers<[1], [0], [0], [1], [0, 0, 1, 1], [], []>} : vector<32x128xbf16>, vector<128x128xbf16>, vector<32x128xf32> -> vector<32x128xf32>
    %52 = arith.truncf %37 : vector<32x128xf32> to vector<32x128xbf16>
    %c1 = arith.constant 1 : index
    %c0_17 = arith.constant 0 : index
    %c0_18 = arith.constant 0 : index
    %53 = vector.load %arg1[%c1, %c0_17, %c0_18] : memref<3x128x128xbf16, #tpu.memory_space<vmem>>, vector<1x128x128xbf16>
    %54 = vector.shape_cast %53 : vector<1x128x128xbf16> to vector<128x128xbf16>
    %cst_19 = arith.constant dense<0.000000e+00> : vector<32x128xf32>
    %55 = tpu.matmul %52, %54, %cst_19 {dimension_numbers = #tpu.dot_dimension_numbers<[1], [0], [0], [1], [0, 0, 1, 1], [], []>} : vector<32x128xbf16>, vector<128x128xbf16>, vector<32x128xf32> -> vector<32x128xf32>
    %56 = arith.addf %51, %55 : vector<32x128xf32>
    %57 = arith.truncf %47 : vector<32x128xf32> to vector<32x128xbf16>
    %c2 = arith.constant 2 : index
    %c0_20 = arith.constant 0 : index
    %c0_21 = arith.constant 0 : index
    %58 = vector.load %arg1[%c2, %c0_20, %c0_21] : memref<3x128x128xbf16, #tpu.memory_space<vmem>>, vector<1x128x128xbf16>
    %59 = vector.shape_cast %58 : vector<1x128x128xbf16> to vector<128x128xbf16>
    %cst_22 = arith.constant dense<0.000000e+00> : vector<32x128xf32>
    %60 = tpu.matmul %57, %59, %cst_22 {dimension_numbers = #tpu.dot_dimension_numbers<[1], [0], [0], [1], [0, 0, 1, 1], [], []>} : vector<32x128xbf16>, vector<128x128xbf16>, vector<32x128xf32> -> vector<32x128xf32>
    %61 = arith.addf %56, %60 : vector<32x128xf32>
    %cst_23 = arith.constant dense<0.000000e+00> : vector<128xf32>
    %62 = vector.multi_reduction <add>, %61, %cst_23 [0] : vector<32x128xf32> to vector<128xf32>
    %63 = vector.shape_cast %62 : vector<128xf32> to vector<1x128xf32>
    %64 = arith.mulf %61, %61 : vector<32x128xf32>
    %cst_24 = arith.constant dense<0.000000e+00> : vector<128xf32>
    %65 = vector.multi_reduction <add>, %64, %cst_24 [0] : vector<32x128xf32> to vector<128xf32>
    %66 = vector.shape_cast %65 : vector<128xf32> to vector<1x128xf32>
    %c0_25 = arith.constant 0 : index
    %c0_26 = arith.constant 0 : index
    %67 = vector.load %arg7[%c0_25, %c0_26] : memref<128x8xf32, #tpu.memory_space<vmem>>, vector<128x8xf32>
    %cst_27 = arith.constant dense<0.000000e+00> : vector<1x8xf32>
    %68 = tpu.matmul %63, %67, %cst_27 {dimension_numbers = #tpu.dot_dimension_numbers<[1], [0], [0], [1], [0, 0, 1, 1], [], []>} : vector<1x128xf32>, vector<128x8xf32>, vector<1x8xf32> -> vector<1x8xf32>
    %c0_28 = arith.constant 0 : index
    %c0_29 = arith.constant 0 : index
    %69 = vector.load %arg7[%c0_28, %c0_29] : memref<128x8xf32, #tpu.memory_space<vmem>>, vector<128x8xf32>
    %cst_30 = arith.constant dense<0.000000e+00> : vector<1x8xf32>
    %70 = tpu.matmul %66, %69, %cst_30 {dimension_numbers = #tpu.dot_dimension_numbers<[1], [0], [0], [1], [0, 0, 1, 1], [], []>} : vector<1x128xf32>, vector<128x8xf32>, vector<1x8xf32> -> vector<1x8xf32>
    %cst_31 = arith.constant 5.120000e+02 : f32
    %71 = vector.broadcast %cst_31 : f32 to vector<1x8xf32>
    %72 = arith.divf %68, %71 : vector<1x8xf32>
    %cst_32 = arith.constant 5.120000e+02 : f32
    %73 = vector.broadcast %cst_32 : f32 to vector<1x8xf32>
    %74 = arith.divf %70, %73 : vector<1x8xf32>
    %75 = arith.mulf %72, %72 : vector<1x8xf32>
    %76 = arith.subf %74, %75 : vector<1x8xf32>
    %c0_33 = arith.constant 0 : index
    %c0_34 = arith.constant 0 : index
    %77 = vector.load %arg2[%c0_33, %c0_34] : memref<1x8xf32, #tpu.memory_space<vmem>>, vector<1x8xf32>
    %cst_35 = arith.constant 9.99999974E-6 : f32
    %78 = vector.broadcast %cst_35 : f32 to vector<1x8xf32>
    %79 = arith.addf %76, %78 : vector<1x8xf32>
    %80 = math.rsqrt %79 : vector<1x8xf32>
    %81 = arith.mulf %77, %80 : vector<1x8xf32>
    %c0_36 = arith.constant 0 : index
    %c0_37 = arith.constant 0 : index
    %82 = vector.load %arg3[%c0_36, %c0_37] : memref<1x8xf32, #tpu.memory_space<vmem>>, vector<1x8xf32>
    %83 = arith.mulf %72, %81 : vector<1x8xf32>
    %84 = arith.subf %82, %83 : vector<1x8xf32>
    %c0_38 = arith.constant 0 : index
    %c0_39 = arith.constant 0 : index
    %85 = vector.load %arg8[%c0_38, %c0_39] : memref<8x128xf32, #tpu.memory_space<vmem>>, vector<8x128xf32>
    %cst_40 = arith.constant dense<0.000000e+00> : vector<1x128xf32>
    %86 = tpu.matmul %81, %85, %cst_40 {dimension_numbers = #tpu.dot_dimension_numbers<[1], [0], [0], [1], [0, 0, 1, 1], [], []>} : vector<1x8xf32>, vector<8x128xf32>, vector<1x128xf32> -> vector<1x128xf32>
    %c0_41 = arith.constant 0 : index
    %c0_42 = arith.constant 0 : index
    %87 = vector.load %arg8[%c0_41, %c0_42] : memref<8x128xf32, #tpu.memory_space<vmem>>, vector<8x128xf32>
    %cst_43 = arith.constant dense<0.000000e+00> : vector<1x128xf32>
    %88 = tpu.matmul %84, %87, %cst_43 {dimension_numbers = #tpu.dot_dimension_numbers<[1], [0], [0], [1], [0, 0, 1, 1], [], []>} : vector<1x8xf32>, vector<8x128xf32>, vector<1x128xf32> -> vector<1x128xf32>
    %89 = vector.broadcast %86 : vector<1x128xf32> to vector<32x128xf32>
    %90 = arith.mulf %61, %89 : vector<32x128xf32>
    %91 = vector.broadcast %88 : vector<1x128xf32> to vector<32x128xf32>
    %92 = arith.addf %90, %91 : vector<32x128xf32>
    %cst_44 = arith.constant 0.000000e+00 : f32
    %93 = vector.broadcast %cst_44 : f32 to vector<32x128xf32>
    %94 = arith.maximumf %92, %93 : vector<32x128xf32>
    %c1_i32_45 = arith.constant 1 : i32
    %95 = tpu.dynamic_rotate %94 by %c1_i32_45 dim 0 : vector<32x128xf32>, i32 -> vector<32x128xf32>
    %cst_46 = arith.constant 0.000000e+00 : f32
    %96 = vector.shape_cast %18 : vector<32x1xi1> to vector<32x1xi1>
    %97 = vector.broadcast %96 : vector<32x1xi1> to vector<32x128xi1>
    %98 = vector.broadcast %cst_46 : f32 to vector<32x128xf32>
    %99 = arith.select %97, %98, %95 : vector<32x128xi1>, vector<32x128xf32>
    %c31_i32_47 = arith.constant 31 : i32
    %100 = tpu.dynamic_rotate %94 by %c31_i32_47 dim 0 : vector<32x128xf32>, i32 -> vector<32x128xf32>
    %cst_48 = arith.constant 0.000000e+00 : f32
    %101 = vector.shape_cast %36 : vector<32x1xi1> to vector<32x1xi1>
    %102 = vector.broadcast %101 : vector<32x1xi1> to vector<32x128xi1>
    %103 = vector.broadcast %cst_48 : f32 to vector<32x128xf32>
    %104 = arith.select %102, %103, %100 : vector<32x128xi1>, vector<32x128xf32>
    %105 = arith.truncf %99 : vector<32x128xf32> to vector<32x128xbf16>
    %c0_49 = arith.constant 0 : index
    %c0_50 = arith.constant 0 : index
    %c0_51 = arith.constant 0 : index
    %106 = vector.load %arg4[%c0_49, %c0_50, %c0_51] : memref<3x128x128xbf16, #tpu.memory_space<vmem>>, vector<1x128x128xbf16>
    %107 = vector.shape_cast %106 : vector<1x128x128xbf16> to vector<128x128xbf16>
    %cst_52 = arith.constant dense<0.000000e+00> : vector<32x128xf32>
    %108 = tpu.matmul %105, %107, %cst_52 {dimension_numbers = #tpu.dot_dimension_numbers<[1], [0], [0], [1], [0, 0, 1, 1], [], []>} : vector<32x128xbf16>, vector<128x128xbf16>, vector<32x128xf32> -> vector<32x128xf32>
    %109 = arith.truncf %94 : vector<32x128xf32> to vector<32x128xbf16>
    %c1_53 = arith.constant 1 : index
    %c0_54 = arith.constant 0 : index
    %c0_55 = arith.constant 0 : index
    %110 = vector.load %arg4[%c1_53, %c0_54, %c0_55] : memref<3x128x128xbf16, #tpu.memory_space<vmem>>, vector<1x128x128xbf16>
    %111 = vector.shape_cast %110 : vector<1x128x128xbf16> to vector<128x128xbf16>
    %cst_56 = arith.constant dense<0.000000e+00> : vector<32x128xf32>
    %112 = tpu.matmul %109, %111, %cst_56 {dimension_numbers = #tpu.dot_dimension_numbers<[1], [0], [0], [1], [0, 0, 1, 1], [], []>} : vector<32x128xbf16>, vector<128x128xbf16>, vector<32x128xf32> -> vector<32x128xf32>
    %113 = arith.addf %108, %112 : vector<32x128xf32>
    %114 = arith.truncf %104 : vector<32x128xf32> to vector<32x128xbf16>
    %c2_57 = arith.constant 2 : index
    %c0_58 = arith.constant 0 : index
    %c0_59 = arith.constant 0 : index
    %115 = vector.load %arg4[%c2_57, %c0_58, %c0_59] : memref<3x128x128xbf16, #tpu.memory_space<vmem>>, vector<1x128x128xbf16>
    %116 = vector.shape_cast %115 : vector<1x128x128xbf16> to vector<128x128xbf16>
    %cst_60 = arith.constant dense<0.000000e+00> : vector<32x128xf32>
    %117 = tpu.matmul %114, %116, %cst_60 {dimension_numbers = #tpu.dot_dimension_numbers<[1], [0], [0], [1], [0, 0, 1, 1], [], []>} : vector<32x128xbf16>, vector<128x128xbf16>, vector<32x128xf32> -> vector<32x128xf32>
    %118 = arith.addf %113, %117 : vector<32x128xf32>
    %cst_61 = arith.constant dense<0.000000e+00> : vector<128xf32>
    %119 = vector.multi_reduction <add>, %118, %cst_61 [0] : vector<32x128xf32> to vector<128xf32>
    %120 = vector.shape_cast %119 : vector<128xf32> to vector<1x128xf32>
    %121 = arith.mulf %118, %118 : vector<32x128xf32>
    %cst_62 = arith.constant dense<0.000000e+00> : vector<128xf32>
    %122 = vector.multi_reduction <add>, %121, %cst_62 [0] : vector<32x128xf32> to vector<128xf32>
    %123 = vector.shape_cast %122 : vector<128xf32> to vector<1x128xf32>
    %c0_63 = arith.constant 0 : index
    %c0_64 = arith.constant 0 : index
    %124 = vector.load %arg7[%c0_63, %c0_64] : memref<128x8xf32, #tpu.memory_space<vmem>>, vector<128x8xf32>
    %cst_65 = arith.constant dense<0.000000e+00> : vector<1x8xf32>
    %125 = tpu.matmul %120, %124, %cst_65 {dimension_numbers = #tpu.dot_dimension_numbers<[1], [0], [0], [1], [0, 0, 1, 1], [], []>} : vector<1x128xf32>, vector<128x8xf32>, vector<1x8xf32> -> vector<1x8xf32>
    %c0_66 = arith.constant 0 : index
    %c0_67 = arith.constant 0 : index
    %126 = vector.load %arg7[%c0_66, %c0_67] : memref<128x8xf32, #tpu.memory_space<vmem>>, vector<128x8xf32>
    %cst_68 = arith.constant dense<0.000000e+00> : vector<1x8xf32>
    %127 = tpu.matmul %123, %126, %cst_68 {dimension_numbers = #tpu.dot_dimension_numbers<[1], [0], [0], [1], [0, 0, 1, 1], [], []>} : vector<1x128xf32>, vector<128x8xf32>, vector<1x8xf32> -> vector<1x8xf32>
    %cst_69 = arith.constant 5.120000e+02 : f32
    %128 = vector.broadcast %cst_69 : f32 to vector<1x8xf32>
    %129 = arith.divf %125, %128 : vector<1x8xf32>
    %cst_70 = arith.constant 5.120000e+02 : f32
    %130 = vector.broadcast %cst_70 : f32 to vector<1x8xf32>
    %131 = arith.divf %127, %130 : vector<1x8xf32>
    %132 = arith.mulf %129, %129 : vector<1x8xf32>
    %133 = arith.subf %131, %132 : vector<1x8xf32>
    %c0_71 = arith.constant 0 : index
    %c0_72 = arith.constant 0 : index
    %134 = vector.load %arg5[%c0_71, %c0_72] : memref<1x8xf32, #tpu.memory_space<vmem>>, vector<1x8xf32>
    %cst_73 = arith.constant 9.99999974E-6 : f32
    %135 = vector.broadcast %cst_73 : f32 to vector<1x8xf32>
    %136 = arith.addf %133, %135 : vector<1x8xf32>
    %137 = math.rsqrt %136 : vector<1x8xf32>
    %138 = arith.mulf %134, %137 : vector<1x8xf32>
    %c0_74 = arith.constant 0 : index
    %c0_75 = arith.constant 0 : index
    %139 = vector.load %arg6[%c0_74, %c0_75] : memref<1x8xf32, #tpu.memory_space<vmem>>, vector<1x8xf32>
    %140 = arith.mulf %129, %138 : vector<1x8xf32>
    %141 = arith.subf %139, %140 : vector<1x8xf32>
    %c0_76 = arith.constant 0 : index
    %c0_77 = arith.constant 0 : index
    %142 = vector.load %arg8[%c0_76, %c0_77] : memref<8x128xf32, #tpu.memory_space<vmem>>, vector<8x128xf32>
    %cst_78 = arith.constant dense<0.000000e+00> : vector<1x128xf32>
    %143 = tpu.matmul %138, %142, %cst_78 {dimension_numbers = #tpu.dot_dimension_numbers<[1], [0], [0], [1], [0, 0, 1, 1], [], []>} : vector<1x8xf32>, vector<8x128xf32>, vector<1x128xf32> -> vector<1x128xf32>
    %c0_79 = arith.constant 0 : index
    %c0_80 = arith.constant 0 : index
    %144 = vector.load %arg8[%c0_79, %c0_80] : memref<8x128xf32, #tpu.memory_space<vmem>>, vector<8x128xf32>
    %cst_81 = arith.constant dense<0.000000e+00> : vector<1x128xf32>
    %145 = tpu.matmul %141, %144, %cst_81 {dimension_numbers = #tpu.dot_dimension_numbers<[1], [0], [0], [1], [0, 0, 1, 1], [], []>} : vector<1x8xf32>, vector<8x128xf32>, vector<1x128xf32> -> vector<1x128xf32>
    %146 = vector.broadcast %143 : vector<1x128xf32> to vector<32x128xf32>
    %147 = arith.mulf %118, %146 : vector<32x128xf32>
    %148 = vector.broadcast %145 : vector<1x128xf32> to vector<32x128xf32>
    %149 = arith.addf %147, %148 : vector<32x128xf32>
    %150 = arith.addf %149, %37 : vector<32x128xf32>
    %c0_82 = arith.constant 0 : index
    %c0_83 = arith.constant 0 : index
    %151 = vector.load %arg9[%c0_82, %c0_83] : memref<32x128xf32, #tpu.memory_space<vmem>>, vector<32x128xf32>
    tpu.vector_store %arg9[%c0_82, %c0_83], %150 {strides = array<i32>} : memref<32x128xf32, #tpu.memory_space<vmem>>, vector<32x128xf32>,
    return
  }
}

</mosaic_0001>

<bundles_post_ra>
// kernel: tile.9
= control target key start
LH: loop header
LB: loop body
LE: loop exit
PB: predicated region body
PF: predicated region fallthrough
CT: control target
= control target key end

     0   :  { %vm6_vm0 = vcmask 1043458   ;;  %vm10_vm1 = vcmask 1045508   ;;  %vm14_vm2 = vcmask 1047558   ;;  %s19_s6 = smov 3  ;;  %s22_s7 = smov 12  ;;  %vm16_vm3 = vcmask 64512   ;;  %s736_s0 = inlined_call_operand.vmem [shape: f32[16,8,8], index: 0, kind: input, shape index: {}]   ;;  %s737_s1 = inlined_call_operand.vmem [shape: f32[128,8], index: 1, kind: output, shape index: {}]  }
   0x1   :  { %v348_v0 = vld [vmem:[%s736_s0 + $0xf] ss:$16 sm:%s19_s6]   ;;  %s27_s12 = smov 48  ;;  %s32_s13 = smov 192  ;;  %vm38_vm4 = vcmask 1048512   ;;  %vm60_vm5 = vcmask 982912  }
   0x2   :  { %v349_v1 = vld [vmem:[%s736_s0 + $0xf] ss:$16 sm:%s22_s7]   ;;  %s63_s18 = smov 3  ;;  %s66_s21 = smov 12  ;;  %vm82_vm6 = vcmask 917312   ;;  %vm104_vm7 = vcmask 851712  }
   0x3   :  { %v25_v2 = vsel %vm6_vm0, %v349_v1, %v348_v0  ;;  %v350_v3 = vld [vmem:[%s736_s0 + $0xf] ss:$16 sm:%s27_s12]   ;;  %v356_v6 = vld [vmem:[%s736_s0 + $0xd] ss:$16 sm:%s63_s18]   ;;  %s71_s22 = smov 48  ;;  %s76_s27 = smov 192 }
   0x4   :  { %v351_v4 = vld [vmem:[%s736_s0 + $0xf] ss:$16 sm:%s32_s13]   ;;  %v30_v5 = vsel %vm10_vm1, %v350_v3, %v25_v2  ;;  %v357_v8 = vld [vmem:[%s736_s0 + $0xd] ss:$16 sm:%s66_s21]   ;;  %s423_s28 = smov 120   ;;  %s41_s2 = smov 3 }
   0x5   :  { %v35_v7 = vsel %vm14_vm2, %v351_v4, %v30_v5  ;;  %v358_v9 = vld [vmem:[%s736_s0 + $0xd] ss:$16 sm:%s71_s22]   ;;  %v69_v10 = vsel %vm6_vm0, %v357_v8, %v356_v6  ;;  %s44_s3 = smov 12  ;;  %v352_v13 = vld [vmem:[%s736_s0 + $0xe] ss:$16 sm:%s41_s2]   ;;  %s49_s8 = smov 48 }
   0x6   :  { %36 = vrot.lane.b32.xlu0 %v35_v7, %s423_s28  ;;  %v359_v11 = vld [vmem:[%s736_s0 + $0xd] ss:$16 sm:%s76_s27]   ;;  %v74_v12 = vsel %vm10_vm1, %v358_v9, %v69_v10  ;;  %s54_s9 = smov 192  ;;  %s85_s14 = smov 3  ;;  %vm126_vm8 = vcmask 786112   ;;  %vm148_vm9 = vcmask 720512  }
   0x7   :  { %v353_v14 = vld [vmem:[%s736_s0 + $0xe] ss:$16 sm:%s44_s3]   ;;  %v79_v15 = vsel %vm14_vm2, %v359_v11, %v74_v12  ;;  %s424_s15 = smov 104   ;;  %v360_v20 = vld [vmem:[%s736_s0 + $0xc] ss:$16 sm:%s85_s14]   ;;  %s88_s18 = smov 12 }
   0x8   :  { %v47_v16 = vsel %vm6_vm0, %v353_v14, %v352_v13  ;;  %v354_v17 = vld [vmem:[%s736_s0 + $0xe] ss:$16 sm:%s49_s8]   ;;  %80 = vrot.lane.b32.xlu1 %v79_v15, %s424_s15  ;;  %s93_s19 = smov 48  ;;  %s98_s24 = smov 192  ;;  %vm170_vm10 = vcmask 654912   ;;  %vm192_vm11 = vcmask 589312  }
   0x9   :  { %v355_v18 = vld [vmem:[%s736_s0 + $0xe] ss:$16 sm:%s54_s9]   ;;  %v52_v19 = vsel %vm10_vm1, %v354_v17, %v47_v16  ;;  %v361_v21 = vld [vmem:[%s736_s0 + $0xc] ss:$16 sm:%s88_s18]   ;;  %s151_s27 = smov 3  ;;  %s154_s28 = smov 12 }
   0xa   :  { %v362_v22 = vld [vmem:[%s736_s0 + $0xc] ss:$16 sm:%s93_s19]   ;;  %v57_v23 = vsel %vm14_vm2, %v355_v18, %v52_v19  ;;  %v91_v24 = vsel %vm6_vm0, %v361_v21, %v360_v20  ;;  %v372_v27 = vld [vmem:[%s736_s0 + $0x9] ss:$16 sm:%s151_s27]   ;;  %s159_s4 = smov 48  ;;  %s164_s7 = smov 192 }
   0xb   :  { %v363_v25 = vld [vmem:[%s736_s0 + $0xc] ss:$16 sm:%s98_s24]   ;;  %v96_v26 = vsel %vm10_vm1, %v362_v22, %v91_v24  ;;  %v373_v28 = vld [vmem:[%s736_s0 + $0x9] ss:$16 sm:%s154_s28]   ;;  %s173_s8 = smov 3  ;;  %s425_s9 = smov 112  }
   0xc   :  { %v157_v29 = vsel %vm6_vm0, %v373_v28, %v372_v27  ;;  %v374_v30 = vld [vmem:[%s736_s0 + $0x9] ss:$16 sm:%s159_s4]   ;;  %v101_v31 = vsel %vm14_vm2, %v363_v25, %v96_v26  ;;  %v376_v32 = vld [vmem:[%s736_s0 + $0x8] ss:$16 sm:%s173_s8]   ;;  %s176_s12 = smov 12  ;;  %s181_s13 = smov 48 }
   0xd   :  { %v377_v33 = vld [vmem:[%s736_s0 + $0x8] ss:$16 sm:%s176_s12]   ;;  %s186_s16 = smov 192  ;;  %v162_v34 = vsel %vm10_vm1, %v374_v30, %v157_v29  ;;  %v375_v35 = vld [vmem:[%s736_s0 + $0x9] ss:$16 sm:%s164_s7]   ;;  %s217_s21 = smov 3 }
   0xe   :  { %58 = vrot.lane.b32.xlu0 %v57_v23, %s425_s9  ;;  %v179_v36 = vsel %vm6_vm0, %v377_v33, %v376_v32  ;;  %v378_v37 = vld [vmem:[%s736_s0 + $0x8] ss:$16 sm:%s181_s13]   ;;  %s220_s22 = smov 12  ;;  %s426_s23 = smov 96   ;;  %v167_v40 = vsel %vm14_vm2, %v375_v35, %v162_v34  ;;  %vm214_vm12 = vcmask 523712   ;;  %vm236_vm13 = vcmask 458112  }
   0xf   :  { %s225_s24 = smov 48  ;;  %v384_v38 = vld [vmem:[%s736_s0 + $0x6] ss:$16 sm:%s217_s21]   ;;  %s239_s29 = smov 3  ;;  %v184_v41 = vsel %vm10_vm1, %v378_v37, %v179_v36  ;;  %v379_v42 = vld [vmem:[%s736_s0 + $0x8] ss:$16 sm:%s186_s16]  }
  0x10   :  { %102 = vrot.lane.b32.xlu1 %v101_v31, %s426_s23  ;;  %v385_v39 = vld [vmem:[%s736_s0 + $0x6] ss:$16 sm:%s220_s22]   ;;  %s230_s3 = smov 192  ;;  %s242_s4 = smov 12  ;;  %v189_v47 = vsel %vm14_vm2, %v379_v42, %v184_v41  ;;  %vm258_vm14 = vcmask 392512   ;;  %vm280_vm15 = vcmask 326912  }
  0x11   :  { %v386_v43 = vld [vmem:[%s736_s0 + $0x6] ss:$16 sm:%s225_s24]   ;;  %s247_s7 = smov 48  ;;  %v223_v44 = vsel %vm6_vm0, %v385_v39, %v384_v38  ;;  %v388_v45 = vld [vmem:[%s736_s0 + $0x5] ss:$16 sm:%s239_s29]   ;;  %s107_s12 = smov 3 }
  0x12   :  { %v389_v46 = vld [vmem:[%s736_s0 + $0x5] ss:$16 sm:%s242_s4]   ;;  %s110_s13 = smov 12  ;;  %s427_s14 = smov 72   ;;  %v387_v48 = vld [vmem:[%s736_s0 + $0x6] ss:$16 sm:%s230_s3]   ;;  %v228_v52 = vsel %vm10_vm1, %v386_v43, %v223_v44 }
  0x13   :  { %v364_v49 = vld [vmem:[%s736_s0 + $0xb] ss:$16 sm:%s107_s12]   ;;  %s115_s19 = smov 48  ;;  %s120_s20 = smov 192  ;;  %v245_v53 = vsel %vm6_vm0, %v389_v46, %v388_v45  ;;  %v390_v54 = vld [vmem:[%s736_s0 + $0x5] ss:$16 sm:%s247_s7]   ;;  %v233_v61 = vsel %vm14_vm2, %v387_v48, %v228_v52 }
  0x14   :  { %s252_s21 = smov 192  ;;  %v365_v50 = vld [vmem:[%s736_s0 + $0xb] ss:$16 sm:%s110_s13]   ;;  %s283_s26 = smov 3  ;;  %v250_v62 = vsel %vm10_vm1, %v390_v54, %v245_v53 }
  0x15   :  { %v366_v51 = vld [vmem:[%s736_s0 + $0xb] ss:$16 sm:%s115_s19]   ;;  %v113_v55 = vsel %vm6_vm0, %v365_v50, %v364_v49  ;;  %s286_s2 = smov 12  ;;  %s428_s3 = smov 64   ;;  %v396_v59 = vld [vmem:[%s736_s0 + $0x3] ss:$16 sm:%s283_s26]  }
  0x16   :  { %168 = vrot.lane.b32.xlu0 %v167_v40, %s427_s14  ;;  %v367_v56 = vld [vmem:[%s736_s0 + $0xb] ss:$16 sm:%s120_s20]   ;;  %v118_v57 = vsel %vm10_vm1, %v366_v51, %v113_v55  ;;  %s291_s4 = smov 48  ;;  %s305_s9 = smov 3 }
  0x17   :  { %v123_v58 = vsel %vm14_vm2, %v367_v56, %v118_v57  ;;  %v397_v60 = vld [vmem:[%s736_s0 + $0x3] ss:$16 sm:%s286_s2]   ;;  %s308_s10 = smov 12  ;;  %v391_v63 = vld [vmem:[%s736_s0 + $0x5] ss:$16 sm:%s252_s21]   ;;  %s429_s13 = smov 88  }
  0x18   :  { %190 = vrot.lane.b32.xlu1 %v189_v47, %s428_s3  ;;  %124 = vrot.lane.b32.xlu2 %v123_v58, %s429_s13  ;;  %s296_s14 = smov 192  ;;  %s313_s15 = smov 48  ;;  %v398_v0 = vld [vmem:[%s736_s0 + $0x3] ss:$16 sm:%s291_s4]   ;;  %v289_v2 = vsel %vm6_vm0, %v397_v60, %v396_v59  ;;  %v255_v5 = vsel %vm14_vm2, %v391_v63, %v250_v62 }
  0x19   :  { %v400_v1 = vld [vmem:[%s736_s0 + $0x2] ss:$16 sm:%s305_s9]   ;;  %s129_s20 = smov 3  ;;  %s132_s25 = smov 12  ;;  %v399_v6 = vld [vmem:[%s736_s0 + $0x3] ss:$16 sm:%s296_s14]   ;;  %v294_v12 = vsel %vm10_vm1, %v398_v0, %v289_v2 }
  0x1a   :  { %v401_v3 = vld [vmem:[%s736_s0 + $0x2] ss:$16 sm:%s308_s10]   ;;  %v368_v4 = vld [vmem:[%s736_s0 + $0xa] ss:$16 sm:%s129_s20]   ;;  %s137_s26 = smov 48  ;;  %s430_s27 = smov 48   ;;  %v299_v20 = vsel %vm14_vm2, %v399_v6, %v294_v12 }
  0x1b   :  { %v402_v7 = vld [vmem:[%s736_s0 + $0x2] ss:$16 sm:%s313_s15]   ;;  %s318_s3 = smov 192  ;;  %v369_v8 = vld [vmem:[%s736_s0 + $0xa] ss:$16 sm:%s132_s25]   ;;  %s142_s6 = smov 192  ;;  %v311_v13 = vsel %vm6_vm0, %v401_v3, %v400_v1 }
  0x1c   :  { %v135_v9 = vsel %vm6_vm0, %v369_v8, %v368_v4  ;;  %v370_v10 = vld [vmem:[%s736_s0 + $0xa] ss:$16 sm:%s137_s26]   ;;  %s195_s11 = smov 3  ;;  %s198_s12 = smov 12  ;;  %v316_v21 = vsel %vm10_vm1, %v402_v7, %v311_v13  ;;  %v403_v22 = vld [vmem:[%s736_s0 + $0x2] ss:$16 sm:%s318_s3]  }
  0x1d   :  { %v371_v11 = vld [vmem:[%s736_s0 + $0xa] ss:$16 sm:%s142_s6]   ;;  %v140_v14 = vsel %vm10_vm1, %v370_v10, %v135_v9  ;;  %v380_v15 = vld [vmem:[%s736_s0 + $0x7] ss:$16 sm:%s195_s11]   ;;  %s203_s17 = smov 48  ;;  %s431_s18 = smov 40   ;;  %v321_v25 = vsel %vm14_vm2, %v403_v22, %v316_v21 }
  0x1e   :  { %234 = vrot.lane.b32.xlu0 %v233_v61, %s430_s27  ;;  %v381_v16 = vld [vmem:[%s736_s0 + $0x7] ss:$16 sm:%s198_s12]   ;;  %v145_v17 = vsel %vm14_vm2, %v371_v11, %v140_v14  ;;  %s208_s21 = smov 192  ;;  %s432_s24 = smov 80  }
  0x1f   :  { %v201_v18 = vsel %vm6_vm0, %v381_v16, %v380_v15  ;;  %v382_v19 = vld [vmem:[%s736_s0 + $0x7] ss:$16 sm:%s203_s17]   ;;  %s261_s25 = smov 3  ;;  %s264_s26 = smov 12 }
  0x20   :  { %256 = vrot.lane.b32.xlu1 %v255_v5, %s431_s18  ;;  %146 = vrot.lane.b32.xlu2 %v145_v17, %s432_s24  ;;  %v206_v23 = vsel %vm10_vm1, %v382_v19, %v201_v18  ;;  %v383_v24 = vld [vmem:[%s736_s0 + $0x7] ss:$16 sm:%s208_s21]   ;;  %s433_s29 = smov 24   ;;  %s269_s5 = smov 48 }
  0x21   :  { %v392_v26 = vld [vmem:[%s736_s0 + $0x4] ss:$16 sm:%s261_s25]   ;;  %v211_v28 = vsel %vm14_vm2, %v383_v24, %v206_v23  ;;  %s434_s6 = smov 16   ;;  %s274_s9 = smov 192 }
  0x22   :  { %v393_v27 = vld [vmem:[%s736_s0 + $0x4] ss:$16 sm:%s264_s26]   ;;  %s435_s10 = smov 56   ;;  %s327_s11 = smov 3 }
  0x23   :  { %v267_v29 = vsel %vm6_vm0, %v393_v27, %v392_v26  ;;  %v394_v30 = vld [vmem:[%s736_s0 + $0x4] ss:$16 sm:%s269_s5]   ;;  %s330_s12 = smov 12  ;;  %v404_v33 = vld [vmem:[%s736_s0 + $0x1] ss:$16 sm:%s327_s11]   ;;  %s335_s19 = smov 48 }
  0x24   :  { %v272_v31 = vsel %vm10_vm1, %v394_v30, %v267_v29  ;;  %v395_v32 = vld [vmem:[%s736_s0 + $0x4] ss:$16 sm:%s274_s9]   ;;  %v405_v34 = vld [vmem:[%s736_s0 + $0x1] ss:$16 sm:%s330_s12]   ;;  %s340_s22 = smov 192  ;;  %s436_s23 = smov 32  }
  0x25   :  { %v277_v35 = vsel %vm14_vm2, %v395_v32, %v272_v31  ;;  %v333_v36 = vsel %vm6_vm0, %v405_v34, %v404_v33  ;;  %v406_v37 = vld [vmem:[%s736_s0 + $0x1] ss:$16 sm:%s335_s19]   ;;  %s437_s26 = smov 8   ;;  %s2_s27 = smov 3 }
  0x26   :  { %300 = vrot.lane.b32.xlu0 %v299_v20, %s433_s29  ;;  %v338_v38 = vsel %vm10_vm1, %v406_v37, %v333_v36  ;;  %v407_v39 = vld [vmem:[%s736_s0 + $0x1] ss:$16 sm:%s340_s22]   ;;  %s4_s28 = smov 12  ;;  %s8_s29 = smov 48 }
  0x27   :  { %v343_v40 = vsel %vm14_vm2, %v407_v39, %v338_v38  ;;  %s12_s30 = smov 192  ;;  %v3_v41 = vld [vmem:[%s736_s0] ss:$16 sm:%s2_s27]  }
  0x28   :  { %322 = vrot.lane.b32.xlu1 %v321_v25, %s434_s6  ;;  %212 = vrot.lane.b32.xlu2 %v211_v28, %s435_s10  ;;  %v5_v42 = vld [vmem:[%s736_s0] ss:$16 sm:%s4_s28]  }
  0x29   :  { %v7_v43 = vsel %vm6_vm0, %v5_v42, %v3_v41  ;;  %v9_v44 = vld [vmem:[%s736_s0] ss:$16 sm:%s8_s29]   ;;  %vm302_vm0 = vcmask 261312  }
  0x2a   :  { %v11_v45 = vsel %vm10_vm1, %v9_v44, %v7_v43  ;;  %v13_v46 = vld [vmem:[%s736_s0] ss:$16 sm:%s12_s30]   ;;  %vm324_vm1 = vcmask 195712  }
  0x2b   :  { %v15_v47 = vsel %vm14_vm2, %v13_v46, %v11_v45  ;;  %vm346_vm2 = vcmask 130112  }
  0x2c   :  { %17 = vst.msk [vmem:[%s737_s1] sm:$0xff] %vm16_vm3, %v15_v47  }
  0x30   :  { %278 = vrot.lane.b32.xlu2 %v277_v35, %s436_s23 }
  0x38   :  { %344 = vrot.lane.b32.xlu2 %v343_v40, %s437_s26 }
  0x72   :  { %v125_v48 = vpop.permute.xlu2 %124  }
  0x78   :  { %v37_v49 = vpop.permute.xlu0 %36  }
  0x79   :  { %39 = vst.msk [vmem:[%s737_s1] sm:$0xff] %vm38_vm4, %v37_v49  }
  0x7a   :  { %v81_v50 = vpop.permute.xlu1 %80   ;;  %v147_v51 = vpop.permute.xlu2 %146  }
  0x80   :  { %v59_v52 = vpop.permute.xlu0 %58  }
  0x81   :  { %61 = vst.msk [vmem:[%s737_s1] sm:$0xff] %vm60_vm5, %v59_v52  }
  0x82   :  { %83 = vst.msk [vmem:[%s737_s1] sm:$0xff] %vm82_vm6, %v81_v50   ;;  %v103_v53 = vpop.permute.xlu1 %102   ;;  %v213_v54 = vpop.permute.xlu2 %212  }
  0x83   :  { %105 = vst.msk [vmem:[%s737_s1] sm:$0xff] %vm104_vm7, %v103_v53  }
  0x84   :  { %127 = vst.msk [vmem:[%s737_s1] sm:$0xff] %vm126_vm8, %v125_v48  }
  0x85   :  { %149 = vst.msk [vmem:[%s737_s1] sm:$0xff] %vm148_vm9, %v147_v51  }
  0x88   :  { %v169_v55 = vpop.permute.xlu0 %168  }
  0x89   :  { %171 = vst.msk [vmem:[%s737_s1] sm:$0xff] %vm170_vm10, %v169_v55  }
  0x8a   :  { %v191_v56 = vpop.permute.xlu1 %190   ;;  %v279_v57 = vpop.permute.xlu2 %278  }
  0x8b   :  { %193 = vst.msk [vmem:[%s737_s1] sm:$0xff] %vm192_vm11, %v191_v56  }
  0x8c   :  { %215 = vst.msk [vmem:[%s737_s1] sm:$0xff] %vm214_vm12, %v213_v54  }
  0x90   :  { %v235_v58 = vpop.permute.xlu0 %234  }
  0x91   :  { %237 = vst.msk [vmem:[%s737_s1] sm:$0xff] %vm236_vm13, %v235_v58  }
  0x92   :  { %v257_v59 = vpop.permute.xlu1 %256   ;;  %v345_v60 = vpop.permute.xlu2 %344  }
  0x93   :  { %259 = vst.msk [vmem:[%s737_s1] sm:$0xff] %vm258_vm14, %v257_v59  }
  0x94   :  { %281 = vst.msk [vmem:[%s737_s1] sm:$0xff] %vm280_vm15, %v279_v57  }
  0x98   :  { %v301_v61 = vpop.permute.xlu0 %300  }
  0x99   :  { %303 = vst.msk [vmem:[%s737_s1] sm:$0xff] %vm302_vm0, %v301_v61  }
  0x9a   :  { %v323_v62 = vpop.permute.xlu1 %322  }
  0x9b   :  { %325 = vst.msk [vmem:[%s737_s1] sm:$0xff] %vm324_vm1, %v323_v62  }
  0x9c   :  { %347 = vst.msk [vmem:[%s737_s1] sm:$0xff] %vm346_vm2, %v345_v60  }

// kernel: res_block.1
= control target key start
LH: loop header
LB: loop body
LE: loop exit
PB: predicated region body
PF: predicated region fallthrough
CT: control target
= control target key end

     0   :  { %v32_v12 = vlaneseq  ;;  %vm1354_vm4 = vmmov 1   ;;  %vm506_vm15 = vcmask 64512   ;;  %s1885_s1 = inlined_call_operand.vmem [shape: bf16[3,128,128], index: 1, kind: input, shape index: {}]   ;;  %s1886_s0 = inlined_call_operand.vmem [shape: f32[32,128], index: 0, kind: input, shape index: {}]   ;;  %s1887_s7 = inlined_call_operand.vmem [shape: f32[128,8], index: 7, kind: input, shape index: {}]   ;;  %s1888_s8 = inlined_call_operand.vmem [shape: f32[8,128], index: 8, kind: input, shape index: {}]   ;;  %s1889_s4 = inlined_call_operand.vmem [shape: bf16[3,128,128], index: 4, kind: input, shape index: {}]   ;;  %s1890_s2 = inlined_call_operand.vmem [shape: f32[1,8], index: 2, kind: input, shape index: {}]   ;;  %s1891_s3 = inlined_call_operand.vmem [shape: f32[1,8], index: 3, kind: input, shape index: {}]   ;;  %s1892_s5 = inlined_call_operand.vmem [shape: f32[1,8], index: 5, kind: input, shape index: {}]   ;;  %s1893_s6 = inlined_call_operand.vmem [shape: f32[1,8], index: 6, kind: input, shape index: {}]   ;;  %s1894_s9 = inlined_call_operand.vmem [shape: f32[32,128], index: 9, kind: output, shape index: {}]  }
   0x1   :  { %v1309_v0 = vld [vmem:[%s1885_s1 + $0x78] sm:$0xff]  ;;  %v1308_v3 = vld [vmem:[%s1885_s1 + $0x70] sm:$0xff]  ;;  %v1307_v6 = vld [vmem:[%s1885_s1 + $0x68] sm:$0xff] }
   0x2   :  { %v1301_v1 = vld [vmem:[%s1885_s1 + $0x38] sm:$0xff]  ;;  %224 = vmatpush.bf16.msra.mxu0 %v1309_v0  ;;  %v1300_v4 = vld [vmem:[%s1885_s1 + $0x30] sm:$0xff]  ;;  %v1299_v7 = vld [vmem:[%s1885_s1 + $0x28] sm:$0xff]  ;;  %v1451_v16 = vshrl.u32 %v32_v12, 7 }
   0x3   :  { %v1317_v2 = vld [vmem:[%s1885_s1 + $0xb8] sm:$0xff]  ;;  %291 = vmatpush.bf16.msra.mxu1 %v1301_v1  ;;  %v1316_v5 = vld [vmem:[%s1885_s1 + $0xb0] sm:$0xff]  ;;  %v1315_v8 = vld [vmem:[%s1885_s1 + $0xa8] sm:$0xff] }
   0x4   :  { %377 = vmatpush.bf16.msra.mxu2 %v1317_v2  ;;  %v1306_v9 = vld [vmem:[%s1885_s1 + $0x60] sm:$0xff]  ;;  %v1305_v13 = vld [vmem:[%s1885_s1 + $0x58] sm:$0xff]  ;;  %v1304_v17 = vld [vmem:[%s1885_s1 + $0x50] sm:$0xff]  ;;  %v34_v23 = vadd.s32 8, %v1451_v16  ;;  %v41_v27 = vand.u32 15, %v1451_v16  ;;  %vm101_vm0 = vcmp.lt.s32.totalorder %v1451_v16, 1 }
   0x5   :  { %v1298_v10 = vld [vmem:[%s1885_s1 + $0x20] sm:$0xff]  ;;  %v1297_v14 = vld [vmem:[%s1885_s1 + $0x18] sm:$0xff]  ;;  %v1296_v18 = vld [vmem:[%s1885_s1 + $0x10] sm:$0xff]  ;;  %vm122_vm1 = vcmp.lt.s32.totalorder %v1451_v16, 7  ;;  %v35_v48 = vadd.s32 16, %v1451_v16  ;;  %v36_v49 = vadd.s32 24, %v1451_v16 }
   0x6   :  { %225 = vmatpush.bf16.msra.mxu0 %v1308_v3  ;;  %v1314_v11 = vld [vmem:[%s1885_s1 + $0xa0] sm:$0xff]  ;;  %v1313_v15 = vld [vmem:[%s1885_s1 + $0x98] sm:$0xff]  ;;  %v1312_v19 = vld [vmem:[%s1885_s1 + $0x90] sm:$0xff]  ;;  %v48_v35 = vand.u32 15, %v34_v23  ;;  %vm1342_vm2 = vcmp.ne.s32.totalorder %v41_v27, 0 }
   0x7   :  { %292 = vmatpush.bf16.msra.mxu1 %v1300_v4  ;;  %v1465_v20 = vld [vmem:[%s1886_s0] sm:$0xff]  ;;  %v1470_v21 = vld [vmem:[%s1886_s0 + $0x8] sm:$0xff]  ;;  %v1475_v22 = vld [vmem:[%s1886_s0 + $0x18] sm:$0xff]  ;;  %v55_v51 = vand.u32 15, %v35_v48  ;;  %v62_v53 = vand.u32 15, %v36_v49 }
   0x8   :  { %378 = vmatpush.bf16.msra.mxu2 %v1316_v5  ;;  %v1481_v24 = vld [vmem:[%s1886_s0 + $0x10] sm:$0xff]  ;;  %v1303_v25 = vld [vmem:[%s1885_s1 + $0x48] sm:$0xff]  ;;  %v97_v28 = vrot.slane %v1465_v20, 7  ;;  %v98_v29 = vrot.slane %v1470_v21, 7  ;;  %v100_v30 = vrot.slane %v1475_v22, 7  ;;  %v118_v32 = vrot.slane %v1465_v20, 1  ;;  %vm1521_vm5 = vmpackc.low %vm1354_vm4, %vm1342_vm2 }
   0x9   :  { %v1295_v26 = vld [vmem:[%s1885_s1 + $0x8] sm:$0xff]  ;;  %v119_v33 = vrot.slane %v1470_v21, 1  ;;  %v120_v34 = vrot.slane %v1481_v24, 1  ;;  %v1302_v36 = vld [vmem:[%s1885_s1 + $0x40] sm:$0xff]  ;;  %vm1344_vm3 = vcmp.ne.s32.totalorder %v48_v35, 15  ;;  %v157_v43 = vpack.c.bf16 %v1470_v21, %v1465_v20  ;;  %v1565_v63 = vld [vmem:[%s1887_s7 + $0x78] sm:$0xff] }
   0xa   :  { %226 = vmatpush.bf16.msra.mxu0 %v1307_v6  ;;  %v1311_v31 = vld [vmem:[%s1885_s1 + $0x88] sm:$0xff]  ;;  %v1294_v37 = vld [vmem:[%s1885_s1] sm:$0xff]  ;;  %v104_v38 = vsel %vm101_vm0, %v97_v28, %v98_v29  ;;  %v105_v39 = vsel %vm101_vm0, %v100_v30, %v97_v28  ;;  %vm1526_vm6 = vmpackc.low %vm1344_vm3, %vm1354_vm4  ;;  %v99_v50 = vrot.slane %v1481_v24, 7  ;;  %v121_v52 = vrot.slane %v1475_v22, 1  ;;  %438 = vmatpush.msra.mxu3 %v1565_v63 }
   0xb   :  { %293 = vmatpush.bf16.msra.mxu1 %v1299_v7  ;;  %v1310_v40 = vld [vmem:[%s1885_s1 + $0x80] sm:$0xff]  ;;  %v124_v41 = vsel %vm122_vm1, %v119_v33, %v120_v34  ;;  %v125_v42 = vsel %vm122_vm1, %v118_v32, %v119_v33  ;;  %v1084_v44 = vpack.c.bf16 %v104_v38, %v105_v39  ;;  %vm1343_vm7 = vcmp.ne.s32.totalorder %v55_v51, 0  ;;  %v1572_v0 = vld [vmem:[%s1887_s7 + $0x70] sm:$0xff]  ;;  %v1579_v1 = vld [vmem:[%s1887_s7 + $0x68] sm:$0xff] }
   0xc   :  { %379 = vmatpush.bf16.msra.mxu2 %v1315_v8  ;;  %v1140_v46 = vpack.c.bf16 %v124_v41, %v125_v42  ;;  %v102_v54 = vsel %vm101_vm0, %v99_v50, %v100_v30  ;;  %v103_v55 = vsel %vm101_vm0, %v98_v29, %v99_v50  ;;  %v123_v56 = vsel %vm122_vm1, %v120_v34, %v121_v52  ;;  %vm1549_vm9 = vmpackc.low %vm1354_vm4, %vm1343_vm7  ;;  %v1586_v2 = vld [vmem:[%s1887_s7 + $0x60] sm:$0xff]  ;;  %v1593_v3 = vld [vmem:[%s1887_s7 + $0x58] sm:$0xff] }
   0xd   :  { %v126_v57 = vsel %vm122_vm1, %v121_v52, %v118_v32  ;;  %vm1345_vm8 = vcmp.ne.s32.totalorder %v62_v53, 15  ;;  %v158_v58 = vpack.c.bf16 %v1475_v22, %v1481_v24  ;;  %v1088_v59 = vpack.c.bf16 %v102_v54, %v103_v55  ;;  %439 = vmatpush.msra.mxu3 %v1572_v0  ;;  %v1600_v4 = vld [vmem:[%s1887_s7 + $0x50] sm:$0xff]  ;;  %v1607_v5 = vld [vmem:[%s1887_s7 + $0x48] sm:$0xff]  ;;  %v1614_v6 = vld [vmem:[%s1887_s7 + $0x40] sm:$0xff] }
   0xe   :  { %227 = vmatpush.bf16.msra.mxu0 %v1306_v9  ;;  %v1144_v61 = vpack.c.bf16 %v126_v57, %v123_v56  ;;  %vm1554_vm10 = vmpackc.low %vm1345_vm8, %vm1354_vm4  ;;  %v1621_v9 = vld [vmem:[%s1887_s7 + $0x38] sm:$0xff]  ;;  %v1642_v12 = vld [vmem:[%s1887_s7 + $0x20] sm:$0xff] }
   0xf   :  { %294 = vmatpush.bf16.msra.mxu1 %v1298_v10  ;;  %440 = vmatpush.msra.mxu3 %v1579_v1  ;;  %v1628_v10 = vld [vmem:[%s1887_s7 + $0x30] sm:$0xff]  ;;  %v1668_v23 = vld [vmem:[%s1887_s7] sm:$0xff] }
  0x10   :  { %380 = vmatpush.bf16.msra.mxu2 %v1314_v11  ;;  %v1635_v11 = vld [vmem:[%s1887_s7 + $0x28] sm:$0xff] }
  0x11   :  { %441 = vmatpush.msra.mxu3 %v1586_v2 }
  0x12   :  { %228 = vmatpush.bf16.msra.mxu0 %v1305_v13  ;;  %v1647_v13 = vld [vmem:[%s1887_s7 + $0x18] sm:$0xff] }
  0x13   :  { %295 = vmatpush.bf16.msra.mxu1 %v1297_v14  ;;  %442 = vmatpush.msra.mxu3 %v1593_v3 }
  0x14   :  { %381 = vmatpush.bf16.msra.mxu2 %v1313_v15 }
  0x15   :  { %443 = vmatpush.msra.mxu3 %v1600_v4 }
  0x16   :  { %229 = vmatpush.bf16.msra.mxu0 %v1304_v17 }
  0x17   :  { %296 = vmatpush.bf16.msra.mxu1 %v1296_v18  ;;  %444 = vmatpush.msra.mxu3 %v1607_v5  ;;  %v1654_v18 = vld [vmem:[%s1887_s7 + $0x10] sm:$0xff] }
  0x18   :  { %382 = vmatpush.bf16.msra.mxu2 %v1312_v19  ;;  %v1661_v19 = vld [vmem:[%s1887_s7 + $0x8] sm:$0xff] }
  0x19   :  { %445 = vmatpush.msra.mxu3 %v1614_v6 }
  0x1a   :  { %230 = vmatpush.bf16.msra.mxu0 %v1303_v25 }
  0x1b   :  { %297 = vmatpush.bf16.msra.mxu1 %v1295_v26  ;;  %446 = vmatpush.msra.mxu3 %v1621_v9 }
  0x1c   :  { %383 = vmatpush.bf16.msra.mxu2 %v1311_v31 }
  0x1d   :  { %447 = vmatpush.msra.mxu3 %v1628_v10 }
  0x1e   :  { %231 = vmatpush.bf16.msra.mxu0 %v1302_v36 }
  0x1f   :  { %298 = vmatpush.bf16.msra.mxu1 %v1294_v37  ;;  %448 = vmatpush.msra.mxu3 %v1635_v11 }
  0x20   :  { %384 = vmatpush.bf16.msra.mxu2 %v1310_v40 }
  0x21   :  { %232 = vmatmul.bf16.vlgmr.msra.gmra.mxu0 %v157_v43  ;;  %449 = vmatpush.msra.mxu3 %v1642_v12 }
  0x22   :  { %1085 = vmatmul.msk.bf16.vlgmr.msra.gmra.mxu1 %vm1521_vm5, %v1084_v44  ;;  %458 = vmatpush.msrb.mxu0 %v1565_v63 }
  0x23   :  { %1141 = vmatmul.msk.bf16.vlgmr.msra.gmra.mxu2 %vm1526_vm6, %v1140_v46  ;;  %450 = vmatpush.msra.mxu3 %v1647_v13 }
  0x24   :  { %459 = vmatpush.msrb.mxu0 %v1572_v0 }
  0x25   :  { %451 = vmatpush.msra.mxu3 %v1654_v18 }
  0x26   :  { %460 = vmatpush.msrb.mxu0 %v1579_v1 }
  0x27   :  { %452 = vmatpush.msra.mxu3 %v1661_v19 }
  0x28   :  { %461 = vmatpush.msrb.mxu0 %v1586_v2 }
  0x29   :  { %453 = vmatpush.msra.mxu3 %v1668_v23 }
  0x2a   :  { %462 = vmatpush.msrb.mxu0 %v1593_v3 }
  0x2c   :  { %463 = vmatpush.msrb.mxu0 %v1600_v4 }
  0x2e   :  { %464 = vmatpush.msrb.mxu0 %v1607_v5 }
  0x30   :  { %465 = vmatpush.msrb.mxu0 %v1614_v6 }
  0x31   :  { %237 = vmatmul.bf16.gmra.mxu0 %v158_v58 }
  0x32   :  { %1089 = vmatmul.msk.bf16.gmra.mxu1 %vm1549_vm9, %v1088_v59  ;;  %466 = vmatpush.msrb.mxu0 %v1621_v9 }
  0x33   :  { %1145 = vmatmul.msk.bf16.gmra.mxu2 %vm1554_vm10, %v1144_v61 }
  0x34   :  { %467 = vmatpush.msrb.mxu0 %v1628_v10 }
  0x36   :  { %468 = vmatpush.msrb.mxu0 %v1635_v11 }
  0x38   :  { %469 = vmatpush.msrb.mxu0 %v1642_v12 }
  0x3a   :  { %470 = vmatpush.msrb.mxu0 %v1647_v13 }
  0x3c   :  { %471 = vmatpush.msrb.mxu0 %v1654_v18 }
  0x3e   :  { %472 = vmatpush.msrb.mxu0 %v1661_v19 }
  0x40   :  { %473 = vmatpush.msrb.mxu0 %v1668_v23 }
  0x42   :  { %874 = vmatpush.msra.mxu0 %v1565_v63 }
  0x44   :  { %875 = vmatpush.msra.mxu0 %v1572_v0 }
  0x46   :  { %876 = vmatpush.msra.mxu0 %v1579_v1 }
  0x48   :  { %877 = vmatpush.msra.mxu0 %v1586_v2 }
  0x4a   :  { %878 = vmatpush.msra.mxu0 %v1593_v3 }
  0x4c   :  { %879 = vmatpush.msra.mxu0 %v1600_v4 }
  0x4e   :  { %880 = vmatpush.msra.mxu0 %v1607_v5 }
  0x50   :  { %881 = vmatpush.msra.mxu0 %v1614_v6 }
  0x52   :  { %882 = vmatpush.msra.mxu0 %v1621_v9 }
  0x54   :  { %883 = vmatpush.msra.mxu0 %v1628_v10 }
  0x56   :  { %884 = vmatpush.msra.mxu0 %v1635_v11 }
  0x58   :  { %885 = vmatpush.msra.mxu0 %v1642_v12 }
  0x5a   :  { %886 = vmatpush.msra.mxu0 %v1647_v13 }
  0x5c   :  { %887 = vmatpush.msra.mxu0 %v1654_v18 }
  0x5e   :  { %888 = vmatpush.msra.mxu0 %v1661_v19 }
  0x60   :  { %889 = vmatpush.msra.mxu0 %v1668_v23 }
  0x9e   :  { %v233_v7 = vpop.f32.mrf.mxu0 }
  0x9f   :  { %v300_v8 = vpop.f32.mrf.mxu1 }
  0xa0   :  { %v301_v28 = vadd.f32 %v300_v8, %v233_v7 }
  0xa6   :  { %v386_v14 = vpop.f32.mrf.mxu2  ;;  %v235_v15 = vpop.f32.mrf.mxu0 }
  0xa7   :  { %v302_v17 = vpop.f32.mrf.mxu1  ;;  %v1681_v33 = vadd.f32 %v386_v14, %v301_v28  ;;  %v1713_v28 = vld [vmem:[%s1888_s8] sm:$0xff] }
  0xa8   :  { %v303_v29 = vadd.f32 %v302_v17, %v235_v15  ;;  %v1355_v15 = vmov 512.0   ;;  %525 = vmatpush.msrb.mxu3 %v1713_v28 }
  0xa9   :  { %v409_v38 = vmul.f32 %v1681_v33, %v1681_v33  ;;  %1348 = vrcp.f32 %v1355_v15  ;;  %v1339_v15 = vld [vmem:[%s1889_s4 + $0xa8] sm:$0xff] }
  0xae   :  { %v388_v25 = vpop.f32.mrf.mxu2  ;;  %v238_v26 = vpop.f32.mrf.mxu0 }
  0xaf   :  { %v305_v27 = vpop.f32.mrf.mxu1  ;;  %v1678_v32 = vadd.f32 %v388_v25, %v303_v29  ;;  %v1349_v17 = vpop.eup %1348 }
  0xb0   :  { %v306_v30 = vadd.f32 %v305_v27, %v238_v26  ;;  %v479_v25 = vmul.f32 512.0, %v1349_v17  ;;  %vm483_vm11 = vweird.f32 %v1349_v17 }
  0xb1   :  { %v410_v37 = vmul.f32 %v1678_v32, %v1678_v32  ;;  %v400_v39 = vadd.f32 %v1678_v32, %v1681_v33 }
  0xb2   :  { %v480_v26 = vsub.f32 1.0, %v479_v25  ;;  %v1322_v25 = vld [vmem:[%s1889_s4 + $0x20] sm:$0xff] }
  0xb3   :  { %v413_v43 = vadd.f32 %v410_v37, %v409_v38 }
  0xb4   :  { %v481_v27 = vmul.f32 %v1349_v17, %v480_v26  ;;  %v1338_v26 = vld [vmem:[%s1889_s4 + $0xa0] sm:$0xff] }
  0xb6   :  { %v391_v31 = vpop.f32.mrf.mxu2  ;;  %v240_v35 = vpop.f32.mrf.mxu0  ;;  %v482_v29 = vadd.f32 %v1349_v17, %v481_v27  ;;  %v1329_v27 = vld [vmem:[%s1889_s4 + $0x58] sm:$0xff] }
  0xb7   :  { %v1683_v34 = vadd.f32 %v391_v31, %v306_v30  ;;  %v307_v36 = vpop.f32.mrf.mxu1 }
  0xb8   :  { %v308_v41 = vadd.f32 %v307_v36, %v240_v35  ;;  %v1718_v31 = vsel %vm483_vm11, %v1349_v17, %v482_v29  ;;  %v1321_v29 = vld [vmem:[%s1889_s4 + $0x18] sm:$0xff] }
  0xb9   :  { %v411_v40 = vmul.f32 %v1683_v34, %v1683_v34  ;;  %v401_v44 = vadd.f32 %v400_v39, %v1683_v34 }
  0xbb   :  { %v414_v48 = vadd.f32 %v413_v43, %v411_v40  ;;  %v1333_v40 = vld [vmem:[%s1889_s4 + $0x78] sm:$0xff]  ;;  %v1332_v43 = vld [vmem:[%s1889_s4 + $0x70] sm:$0xff] }
  0xbc   :  { %676 = vmatpush.bf16.msrb.mxu1 %v1333_v40  ;;  %v1335_v40 = vld [vmem:[%s1889_s4 + $0x88] sm:$0xff] }
  0xbe   :  { %v393_v42 = vpop.f32.mrf.mxu2 }
  0xbf   :  { %v1697_v46 = vadd.f32 %v393_v42, %v308_v41  ;;  %v1325_v41 = vld [vmem:[%s1889_s4 + $0x38] sm:$0xff] }
  0xc0   :  { %743 = vmatpush.bf16.msrb.mxu2 %v1325_v41  ;;  %677 = vmatpush.bf16.msrb.mxu1 %v1332_v43  ;;  %v1326_v41 = vld [vmem:[%s1889_s4 + $0x40] sm:$0xff] }
  0xc1   :  { %v402_v49 = vadd.f32 %v401_v44, %v1697_v46  ;;  %v412_v50 = vmul.f32 %v1697_v46, %v1697_v46  ;;  %v1324_v44 = vld [vmem:[%s1889_s4 + $0x30] sm:$0xff]  ;;  %v1334_v43 = vld [vmem:[%s1889_s4 + $0x80] sm:$0xff] }
  0xc3   :  { %v403_v51 = vrot.slane %v402_v49, 4  ;;  %v415_v52 = vadd.f32 %v414_v48, %v412_v50  ;;  %v1331_v48 = vld [vmem:[%s1889_s4 + $0x68] sm:$0xff] }
  0xc4   :  { %744 = vmatpush.bf16.msrb.mxu2 %v1324_v44  ;;  %678 = vmatpush.bf16.msrb.mxu1 %v1331_v48 }
  0xc5   :  { %v416_v53 = vrot.slane %v415_v52, 4  ;;  %v404_v54 = vadd.f32 %v403_v51, %v402_v49  ;;  %v1323_v49 = vld [vmem:[%s1889_s4 + $0x28] sm:$0xff]  ;;  %v1330_v51 = vld [vmem:[%s1889_s4 + $0x60] sm:$0xff] }
  0xc7   :  { %v405_v55 = vrot.slane %v404_v54, 2  ;;  %v417_v56 = vadd.f32 %v416_v53, %v415_v52 }
  0xc8   :  { %745 = vmatpush.bf16.msrb.mxu2 %v1323_v49  ;;  %679 = vmatpush.bf16.msrb.mxu1 %v1330_v51 }
  0xc9   :  { %v406_v57 = vadd.f32 %v405_v55, %v404_v54  ;;  %v418_v58 = vrot.slane %v417_v56, 2 }
  0xcb   :  { %v407_v59 = vrot.slane %v406_v57, 1  ;;  %v419_v61 = vadd.f32 %v418_v58, %v417_v56  ;;  %v489_v56 = vld [vmem:[%s1890_s2] sm:$0x1] }
  0xcc   :  { %746 = vmatpush.bf16.msrb.mxu2 %v1322_v25  ;;  %680 = vmatpush.bf16.msrb.mxu1 %v1329_v27 }
  0xcd   :  { %v408_v7 = vadd.f32 %v407_v59, %v406_v57  ;;  %v420_v8 = vrot.slane %v419_v61, 1  ;;  %v1341_v59 = vld [vmem:[%s1889_s4 + $0xb8] sm:$0xff] }
  0xcf   :  { %454 = vmatmul.f32.vlgmr.msra.gmra.mxu3 %v408_v7  ;;  %v421_v14 = vadd.f32 %v420_v8, %v419_v61  ;;  %v1340_v7 = vld [vmem:[%s1889_s4 + $0xb0] sm:$0xff] }
  0xd0   :  { %548 = vmatpush.msra.mxu3 %v1713_v28  ;;  %747 = vmatpush.bf16.msrb.mxu2 %v1321_v29 }
  0xd1   :  { %474 = vmatmul.f32.vlgmr.msrb.gmra.mxu0 %v421_v14  ;;  %v502_v14 = vld [vmem:[%s1891_s3] sm:$0x1] }
  0xd2   :  { %975 = vmatpush.msrb.mxu0 %v1713_v28 }
 0x14e   :  { %v475_v30 = vpop.f32.mrf.mxu0 }
 0x14f   :  { %v486_v37 = vmul.f32 %v1718_v31, %v475_v30  ;;  %v1337_v30 = vld [vmem:[%s1889_s4 + $0x98] sm:$0xff] }
 0x152   :  { %v455_v35 = vpop.f32.mrf.mxu3 }
 0x153   :  { %v485_v36 = vmul.f32 %v1718_v31, %v455_v35  ;;  %v1328_v35 = vld [vmem:[%s1889_s4 + $0x50] sm:$0xff] }
 0x154   :  { %681 = vmatpush.bf16.msrb.mxu1 %v1328_v35 }
 0x155   :  { %v487_v38 = vmul.f32 %v485_v36, %v485_v36 }
 0x157   :  { %v488_v39 = vsub.f32 %v486_v37, %v487_v38  ;;  %v1336_v37 = vld [vmem:[%s1889_s4 + $0x90] sm:$0xff]  ;;  %v1327_v38 = vld [vmem:[%s1889_s4 + $0x48] sm:$0xff] }
 0x158   :  { %682 = vmatpush.bf16.msrb.mxu1 %v1327_v38 }
 0x159   :  { %v490_v42 = vadd.f32 1e-05, %v488_v39  ;;  %v1319_v39 = vld [vmem:[%s1889_s4 + $0x8] sm:$0xff] }
 0x15b   :  { %1350 = vrsqrt.f32 %v490_v42  ;;  %vm497_vm13 = vweird.f32 %v490_v42 }
 0x15c   :  { %683 = vmatpush.bf16.msrb.mxu1 %v1326_v41 }
 0x160   :  { %894 = vmatpush.msra.mxu1 %v1565_v63 }
 0x161   :  { %v1351_v50 = vpop.eup %1350 }
 0x162   :  { %v492_v52 = vmul.f32 %v1351_v50, %v490_v42  ;;  %vm498_vm12 = vweird.f32 %v1351_v50  ;;  %v1318_v42 = vld [vmem:[%s1889_s4] sm:$0xff]  ;;  %895 = vmatpush.msra.mxu1 %v1572_v0 }
 0x163   :  { %vm499_vm14 = vmor %vm497_vm13, %vm498_vm12 }
 0x164   :  { %v493_v53 = vmul.f32 %v1351_v50, %v492_v52  ;;  %896 = vmatpush.msra.mxu1 %v1579_v1 }
 0x166   :  { %v494_v54 = vmul.f32 0.5, %v493_v53  ;;  %897 = vmatpush.msra.mxu1 %v1586_v2 }
 0x168   :  { %v495_v55 = vsub.f32 1.5, %v494_v54  ;;  %898 = vmatpush.msra.mxu1 %v1593_v3 }
 0x16a   :  { %v496_v57 = vmul.f32 %v1351_v50, %v495_v55  ;;  %899 = vmatpush.msra.mxu1 %v1600_v4 }
 0x16c   :  { %v500_v58 = vsel %vm499_vm14, %v1351_v50, %v496_v57  ;;  %900 = vmatpush.msra.mxu1 %v1607_v5 }
 0x16d   :  { %v501_v61 = vmul.f32 %v500_v58, %v489_v56 }
 0x16e   :  { %901 = vmatpush.msra.mxu1 %v1614_v6 }
 0x16f   :  { %1146 = vmatmul.msk.f32.vlgmr.msrb.gmra.mxu3 %vm506_vm15, %v501_v61  ;;  %v503_v8 = vmul.f32 %v501_v61, %v485_v36  ;;  %v1320_v36 = vld [vmem:[%s1889_s4 + $0x10] sm:$0xff] }
 0x170   :  { %829 = vmatpush.bf16.msrb.mxu3 %v1341_v59  ;;  %748 = vmatpush.bf16.msrb.mxu2 %v1320_v36 }
 0x171   :  { %v504_v17 = vsub.f32 %v502_v14, %v503_v8  ;;  %902 = vmatpush.msra.mxu1 %v1621_v9 }
 0x173   :  { %903 = vmatpush.msra.mxu1 %v1628_v10 }
 0x174   :  { %830 = vmatpush.bf16.msrb.mxu3 %v1340_v7  ;;  %749 = vmatpush.bf16.msrb.mxu2 %v1319_v39 }
 0x175   :  { %904 = vmatpush.msra.mxu1 %v1635_v11 }
 0x177   :  { %1147 = vmatmul.msk.f32.vlgmr.msra.gmra.mxu3 %vm506_vm15, %v504_v17  ;;  %905 = vmatpush.msra.mxu1 %v1642_v12 }
 0x178   :  { %831 = vmatpush.bf16.msrb.mxu3 %v1339_v15  ;;  %750 = vmatpush.bf16.msrb.mxu2 %v1318_v42 }
 0x179   :  { %906 = vmatpush.msra.mxu1 %v1647_v13 }
 0x17b   :  { %907 = vmatpush.msra.mxu1 %v1654_v18 }
 0x17c   :  { %832 = vmatpush.bf16.msrb.mxu3 %v1338_v26  ;;  %952 = vmatpush.msra.mxu2 %v1713_v28 }
 0x17d   :  { %908 = vmatpush.msra.mxu1 %v1661_v19 }
 0x17f   :  { %909 = vmatpush.msra.mxu1 %v1668_v23 }
 0x180   :  { %833 = vmatpush.bf16.msrb.mxu3 %v1337_v30 }
 0x184   :  { %834 = vmatpush.bf16.msrb.mxu3 %v1336_v37 }
 0x188   :  { %835 = vmatpush.bf16.msrb.mxu3 %v1335_v40 }
 0x18c   :  { %836 = vmatpush.bf16.msrb.mxu3 %v1334_v43 }
 0x1f2   :  { %v527_v44 = vpop.f32.mrf.mxu3 }
 0x1f3   :  { %v553_v63 = vperm.slane %v527_v44, 0 }
 0x1f5   :  { %v554_v0 = vmul.f32 %v553_v63, %v1681_v33  ;;  %v555_v2 = vmul.f32 %v553_v63, %v1678_v32  ;;  %v556_v3 = vmul.f32 %v553_v63, %v1683_v34  ;;  %v557_v4 = vmul.f32 %v553_v63, %v1697_v46 }
 0x1fa   :  { %v550_v1 = vpop.f32.mrf.mxu3 }
 0x1fb   :  { %v558_v5 = vperm.slane %v550_v1, 0 }
 0x1fd   :  { %v559_v6 = vadd.f32 %v558_v5, %v554_v0  ;;  %v560_v9 = vadd.f32 %v558_v5, %v555_v2  ;;  %v561_v10 = vadd.f32 %v558_v5, %v556_v3  ;;  %v562_v11 = vadd.f32 %v558_v5, %v557_v4 }
 0x1ff   :  { %v565_v12 = vmax.f32 %v561_v10, 0.0  ;;  %v566_v33 = vmax.f32 %v562_v11, 0.0  ;;  %v563_v28 = vmax.f32 %v559_v6, 0.0  ;;  %v564_v48 = vmax.f32 %v560_v9, 0.0 }
 0x201   :  { %v581_v13 = vrot.slane %v565_v12, 1  ;;  %v579_v32 = vrot.slane %v563_v28, 1  ;;  %v580_v34 = vrot.slane %v564_v48, 1  ;;  %v609_v49 = vpack.c.bf16 %v564_v48, %v563_v28 }
 0x202   :  { %v567_v46 = vrot.slane %v563_v28, 7  ;;  %v568_v50 = vrot.slane %v564_v48, 7  ;;  %v570_v51 = vrot.slane %v566_v33, 7  ;;  %v582_v55 = vrot.slane %v566_v33, 1 }
 0x203   :  { %684 = vmatmul.bf16.vlgmr.msrb.gmra.mxu1 %v609_v49  ;;  %v584_v18 = vsel %vm122_vm1, %v580_v34, %v581_v13  ;;  %v585_v19 = vsel %vm122_vm1, %v579_v32, %v580_v34  ;;  %v569_v56 = vrot.slane %v565_v12, 7  ;;  %v610_v57 = vpack.c.bf16 %v566_v33, %v565_v12 }
 0x204   :  { %v573_v52 = vsel %vm101_vm0, %v567_v46, %v568_v50  ;;  %v574_v23 = vsel %vm101_vm0, %v570_v51, %v567_v46  ;;  %v1286_v53 = vpack.c.bf16 %v584_v18, %v585_v19  ;;  %v583_v58 = vsel %vm122_vm1, %v581_v13, %v582_v55 }
 0x205   :  { %v1230_v54 = vpack.c.bf16 %v573_v52, %v574_v23  ;;  %v586_v59 = vsel %vm122_vm1, %v582_v55, %v579_v32  ;;  %v571_v61 = vsel %vm101_vm0, %v569_v56, %v570_v51  ;;  %v572_v7 = vsel %vm101_vm0, %v568_v50, %v569_v56 }
 0x206   :  { %1287 = vmatmul.msk.bf16.vlgmr.msrb.gmra.mxu3 %vm1526_vm6, %v1286_v53  ;;  %v1290_v47 = vpack.c.bf16 %v586_v59, %v583_v58  ;;  %v1234_v8 = vpack.c.bf16 %v571_v61, %v572_v7  ;;  %v918_v59 = vld [vmem:[%s1892_s5] sm:$0x1] }
 0x207   :  { %1231 = vmatmul.msk.bf16.vlgmr.msrb.gmra.mxu2 %vm1521_vm5, %v1230_v54 }
 0x213   :  { %689 = vmatmul.bf16.gmra.mxu1 %v610_v57 }
 0x216   :  { %1291 = vmatmul.msk.bf16.gmra.mxu3 %vm1554_vm10, %v1290_v47 }
 0x217   :  { %1235 = vmatmul.msk.bf16.gmra.mxu2 %vm1549_vm9, %v1234_v8 }
 0x280   :  { %v685_v45 = vpop.f32.mrf.mxu1 }
 0x288   :  { %v687_v17 = vpop.f32.mrf.mxu1 }
 0x289   :  { %v838_v14 = vpop.f32.mrf.mxu3 }
 0x28a   :  { %v752_v15 = vpop.f32.mrf.mxu2 }
 0x28b   :  { %v753_v35 = vadd.f32 %v752_v15, %v685_v45 }
 0x28d   :  { %v848_v38 = vadd.f32 %v838_v14, %v753_v35 }
 0x28f   :  { %v861_v41 = vmul.f32 %v848_v38, %v848_v38 }
 0x290   :  { %v690_v27 = vpop.f32.mrf.mxu1 }
 0x291   :  { %v840_v25 = vpop.f32.mrf.mxu3 }
 0x292   :  { %v754_v26 = vpop.f32.mrf.mxu2 }
 0x293   :  { %v755_v29 = vadd.f32 %v754_v26, %v687_v17 }
 0x295   :  { %v1847_v37 = vadd.f32 %v840_v25, %v755_v29 }
 0x297   :  { %v862_v60 = vmul.f32 %v1847_v37, %v1847_v37  ;;  %v852_v42 = vadd.f32 %v1847_v37, %v848_v38 }
 0x298   :  { %v692_v39 = vpop.f32.mrf.mxu1 }
 0x299   :  { %v843_v16 = vpop.f32.mrf.mxu3  ;;  %v865_v0 = vadd.f32 %v862_v60, %v861_v41 }
 0x29a   :  { %v757_v30 = vpop.f32.mrf.mxu2 }
 0x29b   :  { %v758_v36 = vadd.f32 %v757_v30, %v690_v27 }
 0x29d   :  { %v1849_v62 = vadd.f32 %v843_v16, %v758_v36 }
 0x29f   :  { %v863_v43 = vmul.f32 %v1849_v62, %v1849_v62  ;;  %v853_v1 = vadd.f32 %v852_v42, %v1849_v62 }
 0x2a1   :  { %v845_v63 = vpop.f32.mrf.mxu3  ;;  %v866_v3 = vadd.f32 %v865_v0, %v863_v43 }
 0x2a2   :  { %v759_v40 = vpop.f32.mrf.mxu2 }
 0x2a3   :  { %v760_v44 = vadd.f32 %v759_v40, %v692_v39 }
 0x2a5   :  { %v851_v2 = vadd.f32 %v845_v63, %v760_v44 }
 0x2a7   :  { %v854_v4 = vadd.f32 %v853_v1, %v851_v2  ;;  %v864_v5 = vmul.f32 %v851_v2, %v851_v2 }
 0x2a9   :  { %v855_v6 = vrot.slane %v854_v4, 4  ;;  %v867_v9 = vadd.f32 %v866_v3, %v864_v5 }
 0x2ab   :  { %v856_v10 = vadd.f32 %v855_v6, %v854_v4  ;;  %v868_v11 = vrot.slane %v867_v9, 4 }
 0x2ad   :  { %v857_v12 = vrot.slane %v856_v10, 2  ;;  %v869_v33 = vadd.f32 %v868_v11, %v867_v9 }
 0x2af   :  { %v858_v28 = vadd.f32 %v857_v12, %v856_v10  ;;  %v870_v48 = vrot.slane %v869_v33, 2 }
 0x2b1   :  { %v859_v13 = vrot.slane %v858_v28, 1  ;;  %v871_v32 = vadd.f32 %v870_v48, %v869_v33 }
 0x2b3   :  { %v860_v34 = vadd.f32 %v859_v13, %v858_v28  ;;  %v872_v49 = vrot.slane %v871_v32, 1 }
 0x2b5   :  { %890 = vmatmul.f32.vlgmr.msra.gmra.mxu0 %v860_v34  ;;  %v873_v46 = vadd.f32 %v872_v49, %v871_v32 }
 0x2b7   :  { %910 = vmatmul.f32.vlgmr.msra.gmra.mxu1 %v873_v46 }
 0x332   :  { %v891_v50 = vpop.f32.mrf.mxu0 }
 0x333   :  { %v914_v51 = vmul.f32 %v891_v50, %v1718_v31 }
 0x334   :  { %v911_v18 = vpop.f32.mrf.mxu1 }
 0x335   :  { %v916_v19 = vmul.f32 %v914_v51, %v914_v51  ;;  %v915_v52 = vmul.f32 %v911_v18, %v1718_v31  ;;  %v931_v31 = vld [vmem:[%s1893_s6] sm:$0x1] }
 0x337   :  { %v917_v23 = vsub.f32 %v915_v52, %v916_v19 }
 0x339   :  { %v919_v53 = vadd.f32 1e-05, %v917_v23 }
 0x33b   :  { %1352 = vrsqrt.f32 %v919_v53  ;;  %vm926_vm1 = vweird.f32 %v919_v53 }
 0x341   :  { %v1353_v54 = vpop.eup %1352 }
 0x342   :  { %v921_v55 = vmul.f32 %v1353_v54, %v919_v53  ;;  %vm927_vm0 = vweird.f32 %v1353_v54 }
 0x343   :  { %vm928_vm2 = vmor %vm926_vm1, %vm927_vm0 }
 0x344   :  { %v922_v56 = vmul.f32 %v1353_v54, %v921_v55 }
 0x346   :  { %v923_v57 = vmul.f32 0.5, %v922_v56 }
 0x348   :  { %v924_v58 = vsub.f32 1.5, %v923_v57 }
 0x34a   :  { %v925_v61 = vmul.f32 %v1353_v54, %v924_v58 }
 0x34c   :  { %v929_v7 = vsel %vm928_vm2, %v1353_v54, %v925_v61 }
 0x34d   :  { %v930_v47 = vmul.f32 %v929_v7, %v918_v59 }
 0x34f   :  { %v932_v8 = vmul.f32 %v930_v47, %v914_v51  ;;  %1292 = vmatmul.msk.f32.vlgmr.msra.gmra.mxu2 %vm506_vm15, %v930_v47 }
 0x351   :  { %v933_v45 = vsub.f32 %v931_v31, %v932_v8 }
 0x353   :  { %1293 = vmatmul.msk.f32.vlgmr.msrb.gmra.mxu0 %vm506_vm15, %v933_v45 }
 0x3d0   :  { %v977_v14 = vpop.f32.mrf.mxu0 }
 0x3d1   :  { %v985_v25 = vperm.slane %v977_v14, 0 }
 0x3d2   :  { %v954_v15 = vpop.f32.mrf.mxu2 }
 0x3d3   :  { %v980_v17 = vperm.slane %v954_v15, 0 }
 0x3d5   :  { %v981_v26 = vmul.f32 %v980_v17, %v848_v38  ;;  %v982_v27 = vmul.f32 %v980_v17, %v1847_v37  ;;  %v983_v29 = vmul.f32 %v980_v17, %v1849_v62  ;;  %v984_v30 = vmul.f32 %v980_v17, %v851_v2 }
 0x3d7   :  { %v986_v16 = vadd.f32 %v985_v25, %v981_v26  ;;  %v987_v35 = vadd.f32 %v985_v25, %v982_v27  ;;  %v988_v36 = vadd.f32 %v985_v25, %v983_v29  ;;  %v989_v60 = vadd.f32 %v985_v25, %v984_v30 }
 0x3d9   :  { %v990_v39 = vadd.f32 %v986_v16, %v1465_v20  ;;  %v991_v40 = vadd.f32 %v987_v35, %v1470_v21  ;;  %v992_v41 = vadd.f32 %v988_v36, %v1481_v24  ;;  %v993_v42 = vadd.f32 %v989_v60, %v1475_v22 }
 0x3db   :  { %994 = vst [vmem:[%s1894_s9] sm:$0xff] %v990_v39 }
 0x3dc   :  { %995 = vst [vmem:[%s1894_s9 + $0x8] sm:$0xff] %v991_v40 }
 0x3dd   :  { %996 = vst [vmem:[%s1894_s9 + $0x10] sm:$0xff] %v992_v41 }
 0x3de   :  { %997 = vst [vmem:[%s1894_s9 + $0x18] sm:$0xff] %v993_v42 }

</bundles_post_ra>
